<compile_context>
chip_gen: v6e
topology: v6e:2x2x1
jax: 0.10.0
libtpu: 0.0.40
codegen_flags: <defaults>
</compile_context>

<pallas_src>
import functools

import jax
import jax.numpy as jnp
from jax.experimental import pallas as pl
from jax.experimental.pallas import tpu as pltpu


def _round_up(a, b):
    return ((a + b - 1) // b) * b


def _vmem_budget():
    """Generation-aware VMEM budget (bytes) used for tile sizing and vmem_limit_bytes."""
    try:
        cap = int(pltpu.get_tpu_info().vmem_capacity_bytes)
        # ~70% of physical, capped at 64 MiB:
        #   v5e/v6e (128 MiB physical) -> 64 MiB, v7x (64 MiB) -> ~45 MiB.
        return min(int(cap * 7 // 10), 64 << 20)
    except Exception:
        return 32 << 20


# ---------------------------------------------------------------------------
# Kernels
# ---------------------------------------------------------------------------
def _gaussian_kernel(x_ref, w_ref, c_ref, out_ref, *, dp, no_exp, exp_bf16):
    """Standard layout: out = (x*x) @ W[:dp] + x @ W[dp:] + c  (optionally exp)."""
    x = x_ref[...].astype(jnp.float32)                                   # (TN, Dp)
    ll = jnp.dot(x * x, w_ref[0:dp, :], preferred_element_type=jnp.float32)
    ll = ll + jnp.dot(x, w_ref[dp:2 * dp, :], preferred_element_type=jnp.float32)
    ll = ll + c_ref[...]                                                 # (1, TM) bias
    if not no_exp:
        if exp_bf16:  # optional v6e/v7x EUP fast path (off by default)
            ll = jnp.exp(ll.astype(jnp.bfloat16)).astype(jnp.float32)
        else:
            ll = jnp.exp(ll)
    out_ref[...] = ll.astype(out_ref.dtype)                              # lane-dense store


def _gaussian_kernel_t(x_ref, wa_ref, wb_ref, c_ref, out_ref, *, no_exp, exp_bf16):
    """Small-M transposed layout: out^T = Wa @ (x^T*x^T) + Wb @ x^T + c."""
    xt = x_ref[...].astype(jnp.float32)                                  # (Dp, TN)
    ll = jnp.dot(wa_ref[...], xt * xt, preferred_element_type=jnp.float32)
    ll = ll + jnp.dot(wb_ref[...], xt, preferred_element_type=jnp.float32)
    ll = ll + c_ref[...]                                                 # (Mp8, 1) bias
    if not no_exp:
        if exp_bf16:
            ll = jnp.exp(ll.astype(jnp.bfloat16)).astype(jnp.float32)
        else:
            ll = jnp.exp(ll)
    out_ref[...] = ll.astype(out_ref.dtype)                              # lane-dense store


# ---------------------------------------------------------------------------
# Tile sizing (honest double-buffer accounting)
# ---------------------------------------------------------------------------
def _pick_block_n(N, Dp, block_m, x_item, out_item, budget, target=1024):
    """Largest N (sublane) tile <= target whose buffers fit the VMEM budget."""
    resident = 2 * (2 * Dp * block_m * 4) + 2 * (block_m * 4)   # dbl-buffered W + bias
    per_row = (2 * Dp * x_item          # double-buffered x tile
               + 2 * Dp * 4             # in-kernel f32 x and x*x temps
               + 2 * block_m * out_item # double-buffered out tile
               + block_m * 4)           # f32 ll temp
    avail = max(budget - resident, per_row * 8)
    bn = max(8, min(target, avail // per_row))
    bn = min(bn, _round_up(N, 8))
    bn = (bn // 128) * 128 if bn >= 128 else (bn // 8) * 8
    if N >= 256:  # guarantee >= 2 grid steps along N so both v7x TCs get work
        bn = min(bn, max(128, (((N + 1) // 2) // 128) * 128))
    return int(max(bn, 8))


def _pick_block_n_t(N, Dp, Mp8, x_item, out_item, budget, target=2048):
    """Lane-axis N tile for the small-M transposed layout."""
    resident = 2 * (2 * Mp8 * Dp * 4 + Mp8 * 4)
    per_col = (2 * Dp * x_item + 2 * Dp * 4 + 2 * Mp8 * out_item + Mp8 * 4)
    avail = max(budget - resident, per_col * 128)
    bn = max(128, min(target, avail // per_col))
    bn = (bn // 128) * 128
    bn = min(bn, _round_up(N, 128))
    if N >= 256:
        bn = min(bn, max(128, (((N + 1) // 2) // 128) * 128))
    return int(max(bn, 128))


# ---------------------------------------------------------------------------
# Wrapper
# ---------------------------------------------------------------------------
def gaussian_forward(x, mu, cov, no_exp=False, block_n=None, layout=None, exp_bf16=False):
    """x: (N, D), mu: (M, 1, D), cov: (M, D) -> likelihoods (N, M) in x.dtype.

    layout: None (auto), "standard" (N on sublanes, M on lanes) or
            "transposed" (small-M path: M on sublanes, N on lanes).
    """
    N, D = x.shape
    M = mu.shape[0]
    out_dtype = x.dtype
    out_item = jnp.dtype(out_dtype).itemsize
    x_item = jnp.dtype(x.dtype).itemsize
    budget = _vmem_budget()

    # ---- fold the Gaussian into matmul weights (plain JAX, done once) ----
    #   -0.5*(x-mu)^2/cov = (x*x)*(-0.5/cov) + x*(mu/cov) - 0.5*mu^2/cov, summed over D
    mu2 = mu[:, 0, :].astype(jnp.float32)                    # (M, D)
    inv_cov = 1.0 / cov.astype(jnp.float32)                  # (M, D)
    w_sq = -0.5 * inv_cov                                    # (M, D) weight for x^2
    w_lin = mu2 * inv_cov                                    # (M, D) weight for x
    bias = -0.5 * jnp.sum(mu2 * mu2 * inv_cov, axis=1)       # (M,)

    Dp = _round_up(D, 8)                                     # sublane-aligned feature dim

    if layout is None:
        layout = "transposed" if M <= 64 else "standard"

    if layout == "transposed":
        # ---- small-M path: out^T (Mp8, Np); M padded only to 8 sublanes ----
        Mp8 = _round_up(max(M, 1), 8)
        wa = jnp.pad(w_sq, ((0, Mp8 - M), (0, Dp - D)))      # (Mp8, Dp)
        wb = jnp.pad(w_lin, ((0, Mp8 - M), (0, Dp - D)))     # (Mp8, Dp)
        c = jnp.pad(bias, (0, Mp8 - M))[:, None]             # (Mp8, 1)

        bn = block_n if block_n is not None else _pick_block_n_t(
            N, Dp, Mp8, x_item, out_item, budget)
        bn = max(128, (int(bn) // 128) * 128)
        Np = _round_up(N, bn)
        xt = jnp.pad(x, ((0, Np - N), (0, Dp - D))).T        # (Dp, Np), zero pad -> finite

        grid = (Np // bn,)
        kernel = functools.partial(_gaussian_kernel_t, no_exp=no_exp, exp_bf16=exp_bf16)
        cost = pl.CostEstimate(
            flops=2 * Np * (2 * Dp) * Mp8,
            transcendentals=0 if no_exp else Np * Mp8,
            bytes_accessed=int(Np * Dp * x_item + Np * Mp8 * out_item
                               + (2 * Mp8 * Dp + Mp8) * 4))

        out_t = pl.pallas_call(
            kernel,
            out_shape=jax.ShapeDtypeStruct((Mp8, Np), out_dtype),
            grid_spec=pltpu.PrefetchScalarGridSpec(
                num_scalar_prefetch=0,
                grid=grid,
                in_specs=[
                    pl.BlockSpec((Dp, bn), lambda i: (0, i)),    # streamed x^T tile
                    pl.BlockSpec((Mp8, Dp), lambda i: (0, 0)),   # resident x^2 weights
                    pl.BlockSpec((Mp8, Dp), lambda i: (0, 0)),   # resident x weights
                    pl.BlockSpec((Mp8, 1), lambda i: (0, 0)),    # resident bias
                ],
                out_specs=pl.BlockSpec((Mp8, bn), lambda i: (0, i)),
            ),
            compiler_params=pltpu.CompilerParams(
                dimension_semantics=("parallel",),               # shards across v7x TCs
                vmem_limit_bytes=int(budget),
            ),
            cost_estimate=cost,
        )(xt, wa, wb, c)
        return out_t[:M, :N].T

    # ---- standard path: N on sublanes, M padded to 128 lanes (+ M tiling) ----
    Mp0 = _round_up(max(M, 1), 128)
    # M tile: keep the double-buffered (2*Dp, block_m) f32 weight within ~1/4 budget.
    bm_cap = max(128, ((budget // 4) // (2 * 2 * Dp * 4) // 128) * 128)
    block_m = min(Mp0, bm_cap)
    Mp = _round_up(Mp0, block_m)

    w = jnp.concatenate([
        jnp.pad(w_sq.T, ((0, Dp - D), (0, Mp - M))),          # rows [0, Dp): x^2 weights
        jnp.pad(w_lin.T, ((0, Dp - D), (0, Mp - M))),         # rows [Dp, 2*Dp): x weights
    ], axis=0)                                                # (2*Dp, Mp)
    c = jnp.pad(bias, (0, Mp - M))[None, :]                   # (1, Mp), pad cols zero -> ll=0

    bn = block_n if block_n is not None else _pick_block_n(
        N, Dp, block_m, x_item, out_item, budget)
    bn = max(8, (int(bn) // 8) * 8)
    Np = _round_up(N, bn)
    xp = jnp.pad(x, ((0, Np - N), (0, Dp - D)))               # zero rows -> finite, sliced off

    grid = (Np // bn, Mp // block_m)
    kernel = functools.partial(_gaussian_kernel, dp=Dp, no_exp=no_exp, exp_bf16=exp_bf16)
    cost = pl.CostEstimate(
        flops=2 * Np * (2 * Dp) * Mp,
        transcendentals=0 if no_exp else Np * Mp,
        bytes_accessed=int(Np * Dp * x_item + Np * Mp * out_item
                           + (Np // bn) * (2 * Dp * Mp + Mp) * 4))

    out = pl.pallas_call(
        kernel,
        out_shape=jax.ShapeDtypeStruct((Np, Mp), out_dtype),
        grid_spec=pltpu.PrefetchScalarGridSpec(
            num_scalar_prefetch=0,
            grid=grid,
            in_specs=[
                pl.BlockSpec((bn, Dp), lambda i, j: (i, 0)),          # streamed x tile
                pl.BlockSpec((2 * Dp, block_m), lambda i, j: (0, j)), # stacked weights
                pl.BlockSpec((1, block_m), lambda i, j: (0, j)),      # folded bias
            ],
            out_specs=pl.BlockSpec((bn, block_m), lambda i, j: (i, j)),
        ),
        compiler_params=pltpu.CompilerParams(
            dimension_semantics=("parallel", "parallel"),             # shards across v7x TCs
            vmem_limit_bytes=int(budget),
        ),
        cost_estimate=cost,
    )(xp, w, c)
    return out[:N, :M]


def gaussian_reference(x, mu, cov, no_exp=False):
    """Direct translation of the PyTorch forward."""
    diff = x[:, None, :] - mu[None, :, 0, :]                  # (N, M, D)
    ll = -0.5 * (diff * diff * (1.0 / cov[None, :, :])).sum(axis=2)
    return ll if no_exp else jnp.exp(ll)


if __name__ == "__main__":
    key = jax.random.PRNGKey(0)
    k_x, k_mu, k_cov, k_x2, k_x3, k_mu3, k_cov3 = jax.random.split(key, 7)

    # Shapes consistent with the module: x (N, D), mu (M, 1, D), cov (M, D).
    N, M, D = 16, 8, 32
    x = jax.random.normal(k_x, (N, D), dtype=jnp.float32)
    mu = jax.random.normal(k_mu, (M, 1, D), dtype=jnp.float32)
    cov = jax.random.uniform(k_cov, (M, D), dtype=jnp.float32, minval=0.5, maxval=1.5)

    # 1) auto layout (small M -> transposed, lane-dense-on-N path)
    out = jax.block_until_ready(gaussian_forward(x, mu, cov, no_exp=False))
    ref = gaussian_reference(x, mu, cov, no_exp=False)
    assert out.shape == (N, M) and out.dtype == x.dtype
    assert jnp.allclose(out, ref, rtol=1e-4, atol=1e-5), "mismatch (transposed)"

    # 2) no_exp path
    out_ne = jax.block_until_ready(gaussian_forward(x, mu, cov, no_exp=True))
    ref_ne = gaussian_reference(x, mu, cov, no_exp=True)
    assert jnp.allclose(out_ne, ref_ne, rtol=1e-4, atol=1e-4), "mismatch (no_exp)"

    # 3) forced standard layout on the same data (M padded to 128 lanes)
    out_s = jax.block_until_ready(gaussian_forward(x, mu, cov, layout="standard"))
    assert out_s.shape == (N, M)
    assert jnp.allclose(out_s, ref, rtol=1e-4, atol=1e-5), "mismatch (standard)"

    # 4) ragged N, multi-step grid, standard layout, explicit block_n
    N2 = 300
    x2 = jax.random.normal(k_x2, (N2, D), dtype=jnp.float32)
    out2 = jax.block_until_ready(
        gaussian_forward(x2, mu, cov, layout="standard", block_n=128))
    ref2 = gaussian_reference(x2, mu, cov)
    assert out2.shape == (N2, M)
    assert jnp.allclose(out2, ref2, rtol=1e-4, atol=1e-4), "mismatch (ragged N)"

    # 5) non-8-aligned D and M > 64 (auto -> standard path, Dp padding)
    N3, M3, D3 = 96, 144, 20
    x3 = jax.random.normal(k_x3, (N3, D3), dtype=jnp.float32)
    mu3 = jax.random.normal(k_mu3, (M3, 1, D3), dtype=jnp.float32)
    cov3 = jax.random.uniform(k_cov3, (M3, D3), dtype=jnp.float32,
                              minval=0.5, maxval=1.5)
    out3 = jax.block_until_ready(gaussian_forward(x3, mu3, cov3))
    ref3 = gaussian_reference(x3, mu3, cov3)
    assert out3.shape == (N3, M3)
    assert jnp.allclose(out3, ref3, rtol=1e-4, atol=1e-4), "mismatch (padded D, M>64)"

    print("KERNEL_OK")
</pallas_src>

<mosaic_0001>
module attributes {stable_mosaic.version = 11 : i64} {
  func.func @_gaussian_kernel_t(%arg0: i32, %arg1: memref<32x128xf32, #tpu.memory_space<vmem>>, %arg2: memref<8x32xf32, #tpu.memory_space<vmem>>, %arg3: memref<8x32xf32, #tpu.memory_space<vmem>>, %arg4: memref<8x1xf32, #tpu.memory_space<vmem>>, %arg5: memref<8x128xf32, #tpu.memory_space<vmem>>) attributes {dimension_semantics = [#tpu.dimension_semantics<parallel>], iteration_bounds = array<i64: 1>, scalar_prefetch = 0 : i64, scratch_operands = 0 : i64, tpu.core_type = #tpu.core_type<tc>, window_params = [{transform_indices = @transform_0, window_bounds = array<i64: 32, 128>}, {pipeline_mode = #tpu.pipeline_mode<synchronous>, transform_indices = @transform_1, window_bounds = array<i64: 8, 32>}, {pipeline_mode = #tpu.pipeline_mode<synchronous>, transform_indices = @transform_2, window_bounds = array<i64: 8, 32>}, {pipeline_mode = #tpu.pipeline_mode<synchronous>, transform_indices = @transform_3, window_bounds = array<i64: 8, 1>}, {transform_indices = @transform_4, window_bounds = array<i64: 8, 128>}]} {
    %c0 = arith.constant 0 : index
    %c0_0 = arith.constant 0 : index
    %0 = vector.load %arg1[%c0, %c0_0] : memref<32x128xf32, #tpu.memory_space<vmem>>, vector<32x128xf32>
    %c0_1 = arith.constant 0 : index
    %c0_2 = arith.constant 0 : index
    %1 = vector.load %arg2[%c0_1, %c0_2] : memref<8x32xf32, #tpu.memory_space<vmem>>, vector<8x32xf32>
    %2 = arith.mulf %0, %0 : vector<32x128xf32>
    %cst = arith.constant dense<0.000000e+00> : vector<8x128xf32>
    %3 = tpu.matmul %1, %2, %cst {dimension_numbers = #tpu.dot_dimension_numbers<[1], [0], [0], [1], [0, 0, 1, 1], [], []>} : vector<8x32xf32>, vector<32x128xf32>, vector<8x128xf32> -> vector<8x128xf32>
    %c0_3 = arith.constant 0 : index
    %c0_4 = arith.constant 0 : index
    %4 = vector.load %arg3[%c0_3, %c0_4] : memref<8x32xf32, #tpu.memory_space<vmem>>, vector<8x32xf32>
    %cst_5 = arith.constant dense<0.000000e+00> : vector<8x128xf32>
    %5 = tpu.matmul %4, %0, %cst_5 {dimension_numbers = #tpu.dot_dimension_numbers<[1], [0], [0], [1], [0, 0, 1, 1], [], []>} : vector<8x32xf32>, vector<32x128xf32>, vector<8x128xf32> -> vector<8x128xf32>
    %6 = arith.addf %3, %5 : vector<8x128xf32>
    %c0_6 = arith.constant 0 : index
    %c0_7 = arith.constant 0 : index
    %7 = vector.load %arg4[%c0_6, %c0_7] : memref<8x1xf32, #tpu.memory_space<vmem>>, vector<8x1xf32>
    %8 = vector.broadcast %7 : vector<8x1xf32> to vector<8x128xf32>
    %9 = arith.addf %6, %8 : vector<8x128xf32>
    %10 = math.exp %9 : vector<8x128xf32>
    %c0_8 = arith.constant 0 : index
    %c0_9 = arith.constant 0 : index
    %11 = vector.load %arg5[%c0_8, %c0_9] : memref<8x128xf32, #tpu.memory_space<vmem>>, vector<8x128xf32>
    tpu.vector_store %arg5[%c0_8, %c0_9], %10 {strides = array<i32>} : memref<8x128xf32, #tpu.memory_space<vmem>>, vector<8x128xf32>,
    return
  }
  func.func @transform_0(%arg0: i32) -> (i32, i32) {
    %c0_i32 = arith.constant 0 : i32
    %c0_i32_0 = arith.constant 0 : i32
    return %c0_i32, %arg0 : i32, i32
  }
  func.func @transform_1(%arg0: i32) -> (i32, i32) {
    %c0_i32 = arith.constant 0 : i32
    %c0_i32_0 = arith.constant 0 : i32
    %c0_i32_1 = arith.constant 0 : i32
    return %c0_i32, %c0_i32_0 : i32, i32
  }
  func.func @transform_2(%arg0: i32) -> (i32, i32) {
    %c0_i32 = arith.constant 0 : i32
    %c0_i32_0 = arith.constant 0 : i32
    %c0_i32_1 = arith.constant 0 : i32
    return %c0_i32, %c0_i32_0 : i32, i32
  }
  func.func @transform_3(%arg0: i32) -> (i32, i32) {
    %c0_i32 = arith.constant 0 : i32
    %c0_i32_0 = arith.constant 0 : i32
    %c0_i32_1 = arith.constant 0 : i32
    return %c0_i32, %c0_i32_0 : i32, i32
  }
  func.func @transform_4(%arg0: i32) -> (i32, i32) {
    %c0_i32 = arith.constant 0 : i32
    %c0_i32_0 = arith.constant 0 : i32
    return %c0_i32, %arg0 : i32, i32
  }
}

</mosaic_0001>

<bundles_post_ra>
// kernel: tpu_custom_call.1
= control target key start
LH: loop header
LB: loop body
LE: loop exit
PB: predicated region body
PF: predicated region fallthrough
CT: control target
= control target key end

     0   :  { %9 = vsyncpa [#allocation3], 0  ;;  %s386_s0 = inlined_call_operand.hbm [shape: f32[32,128], index: 0, kind: input, shape index: {}]   ;;  %s387_s1 = inlined_call_operand.vmem [shape: f32[8,32], index: 1, kind: input, shape index: {}]   ;;  %s388_s2 = inlined_call_operand.hbm [shape: f32[8,32], index: 2, kind: input, shape index: {}]   ;;  %s389_s3 = inlined_call_operand.vmem [shape: f32[8,1], index: 3, kind: input, shape index: {}]   ;;  %s390_s4 = inlined_call_operand.hbm [shape: f32[8,128], index: 4, kind: output, shape index: {}]  }
   0x1   :  { %10 = vsyncpa [#allocation6], 0 }
   0x2   :  { %11 = vsyncpa [#allocation4], 0  ;;  %s338_s15 = smov [#allocation2]  }
   0x3   :  { %s17_s16 = sshll.u32 %s338_s15, 4  ;;  %s18_s16 = int_to_ptr.vmem [resolvable:$true] %s17_s16 }
   0x4   :  { %s280_s17 = scalar_lea.vmem %s18_s16, 512  ;;  %p285_p1 = scmp.lt.s32.totalorder %s18_s16, %s18_s16 }
   0x5   :  { %p281_p0 = scmp.ne.s32.totalorder %s18_s16, %s280_s17  ;;  %p286_p2 = scmp.lt.s32.totalorder %s280_s17, %s280_s17 }
   0x7   :  { %p287_p3 = por %p286_p2, %p285_p1 }
   0x9   :  { %p288_p4 = pnand %p287_p3, %p281_p0 }
   0xb   :  { %291 = shalt.err (!%p288_p4)
}
   0xc   :  { %s339_s18 = smov 128   ;;  %s340_s19 = smov 8  }
   0xd   :  { %23 = dma.hbm_to_vmem [thread:$0]  %s386_s0, 512, %s18_s16, [#allocation3], %s339_s18, %s339_s18, %s340_s19  }
   0xe   :  { %s341_s22 = smov [#allocation5]  }
   0xf   :  { %s32_s23 = sshll.u32 %s341_s22, 4  ;;  %s33_s23 = int_to_ptr.vmem [resolvable:$true] %s32_s23 }
  0x10   :  { %s300_s24 = scalar_lea.vmem %s33_s23, 128  ;;  %p305_p6 = scmp.lt.s32.totalorder %s33_s23, %s33_s23 }
  0x11   :  { %p301_p5 = scmp.ne.s32.totalorder %s33_s23, %s300_s24  ;;  %p306_p7 = scmp.lt.s32.totalorder %s300_s24, %s300_s24 }
  0x13   :  { %p307_p8 = por %p306_p7, %p305_p6 }
  0x15   :  { %p308_p9 = pnand %p307_p8, %p301_p5 }
  0x17   :  { %311 = shalt.err (!%p308_p9)
}
  0x18   :  { %35 = dma.hbm_to_vmem [thread:$0]  %s388_s2, 128, %s33_s23, [#allocation6]  }
  0x19   :  { %332 = dma.done.wait [#allocation3], 512  }
  0x1a   :  { %333 = vsyncadd [#allocation3], 4294966784 }
  0x1b   :  { %334 = dma.done.wait [#allocation6], 128  }
  0x1c   :  { %335 = vsyncadd [#allocation6], 4294967168  ;;  %v342_v0 = vmov 0.0   ;;  %vm343_vm0 = vmmov 0   ;;  %v344_v1 = vmov 0   ;;  %v47_v2 = vld [vmem:[#allocation2 + $0x18] sm:$0xff] }
  0x1d   :  { %239 = vmatprep.subr.mxu0 %v342_v0  ;;  %250 = vmatprep.subr.mxu1 %v342_v0  ;;  %v46_v3 = vld [vmem:[#allocation2 + $0x10] sm:$0xff]  ;;  %v45_v4 = vld [vmem:[#allocation2 + $0x8] sm:$0xff]  ;;  %v52_v6 = vmul.f32 %v47_v2, %v47_v2  ;;  %v44_v7 = vld [vmem:[#allocation2] sm:$0xff]  ;;  %vm54_vm1 = vcmask 261120  }
  0x1e   :  { %247 = vmatprep.mubr.msk.f32.mxu0 %vm343_vm0, %v342_v0  ;;  %258 = vmatprep.mubr.msk.f32.mxu1 %vm343_vm0, %v342_v0  ;;  %v51_v5 = vmul.f32 %v46_v3, %v46_v3  ;;  %v50_v8 = vmul.f32 %v45_v4, %v45_v4  ;;  %v49_v9 = vmul.f32 %v44_v7, %v44_v7  ;;  %v53_v10 = vld [vmem:[#allocation5] sm:$0xff] }
  0x1f   :  { %269 = vset.pattern.permute.xlu0 %v344_v1  ;;  %240 = vmatpush3.msra.mxu0 %v47_v2  ;;  %v201_v11 = vld [vmem:[%s389_s3] sm:$0xff]  ;;  %s345_s3 = smov [#allocation7]  }
  0x20   :  { %241 = vmatprep.subr.mxu0 %v342_v0  ;;  %251 = vmatpush3.msra.mxu1 %v52_v6  ;;  %v48_v12 = vld [vmem:[%s387_s1] sm:$0xff]  ;;  %s217_s29 = sshll.u32 %s345_s3, 4  ;;  %s218_s29 = int_to_ptr.vmem [resolvable:$true] %s217_s29 }
  0x21   :  { %242 = vmatpush3.msra.mxu0 %v46_v3  ;;  %252 = vmatprep.subr.mxu1 %v342_v0  ;;  %s312_s1 = scalar_lea.vmem %s218_s29, 128  ;;  %p317_p11 = scmp.lt.s32.totalorder %s218_s29, %s218_s29 }
  0x22   :  { %243 = vmatprep.subr.mxu0 %v342_v0  ;;  %253 = vmatpush3.msra.mxu1 %v51_v5  ;;  %p313_p10 = scmp.ne.s32.totalorder %s218_s29, %s312_s1  ;;  %p318_p12 = scmp.lt.s32.totalorder %s312_s1, %s312_s1 }
  0x23   :  { %244 = vmatpush3.msra.mxu0 %v45_v4  ;;  %254 = vmatprep.subr.mxu1 %v342_v0 }
  0x24   :  { %245 = vmatprep.subr.mxu0 %v342_v0  ;;  %255 = vmatpush3.msra.mxu1 %v50_v8  ;;  %p319_p13 = por %p318_p12, %p317_p11 }
  0x25   :  { %246 = vmatpush3.msra.mxu0 %v44_v7  ;;  %256 = vmatprep.subr.mxu1 %v342_v0 }
  0x26   :  { %248 = vmatmul.mubr.msk.f32.vlgmr.msra.gmra.mxu0 %vm54_vm1, %v53_v10  ;;  %257 = vmatpush3.msra.mxu1 %v49_v9  ;;  %p320_p0 = pnand %p319_p13, %p313_p10 }
  0x27   :  { %204 = vperm.xlu0 %269, %v201_v11   ;;  %259 = vmatmul.mubr.msk.f32.vlgmr.msra.gmra.mxu1 %vm54_vm1, %v48_v12 }
  0xa2   :  { %v205_v14 = vpop.permute.xlu0 %204 }
  0xe6   :  { %v124_v13 = vpop.f32.mrf.mxu0 }
  0xe7   :  { %v197_v16 = vpop.f32.mrf.mxu1 }
  0xe8   :  { %v249_v15 = vpop.f32.mrf.mxu0  ;;  %v198_v17 = vadd.f32 %v197_v16, %v124_v13 }
  0xe9   :  { %v260_v18 = vpop.f32.mrf.mxu1 }
  0xea   :  { %v207_v19 = vadd.f32 %v205_v14, %v198_v17 }
  0xec   :  { %v208_v20 = vmul.f32 1.442695, %v207_v19 }
  0xee   :  { %270 = vpow2.f32 %v208_v20 }
  0xfb   :  { %v271_v21 = vpop.eup %270 }
  0xfc   :  { %210 = vst [vmem:[#allocation7] sm:$0xff] %v271_v21 }
  0xfd   :  { %323 = shalt.err (!%p320_p0)
}
  0xfe   :  { %220 = dma.vmem_to_hbm [thread:$0]  %s218_s29, 128, %s390_s4, [#allocation4]  }
  0xff   :  { %336 = dma.done.wait [#allocation4], 128  }
 0x100   :  { %337 = vsyncadd [#allocation4], 4294967168 }
 0x101   :  { %224 = vsyncpa [#allocation3], 1 }
 0x102   :  { %225 = vsyncpa [#allocation6], 1 }
 0x103   :  { %226 = vsyncpa [#allocation4], 1 }

</bundles_post_ra>
